<compile_context>
chip_gen: v7x
topology: tpu7x:2x2x1
jax: 0.10.0
libtpu: 0.0.40
codegen_flags: <defaults>
</compile_context>

<pallas_src>
import jax
import jax.numpy as jnp
from jax import lax
from jax.experimental import pallas as pl
from jax.experimental.pallas import tpu as pltpu

SMOOTH = 1e-5


def _dice_loss_kernel(pred_ref, label_ref, out_ref,
                      acc_inter, acc_sqp, acc_sqo):
    # pred_ref  : (1, C, T)  native dtype      label_ref : (1, 1, T) int8/int32
    # out_ref   : (1, 1)     f32 scalar loss
    # acc_*     : (C, 1)     f32 per-class running sums (persist across grid)
    n = pl.program_id(0)
    h = pl.program_id(1)

    @pl.when((n == 0) & (h == 0))
    def _init():
        acc_inter[...] = jnp.zeros_like(acc_inter)
        acc_sqp[...] = jnp.zeros_like(acc_sqp)
        acc_sqo[...] = jnp.zeros_like(acc_sqo)

    p = pred_ref[0].astype(jnp.float32)        # (C, T) widen in-kernel (cheap VPU)
    lab = label_ref[0].astype(jnp.int32)       # (1, T)
    C = p.shape[0]

    # fused one-hot: boolean mask instead of materializing an f32 one-hot
    classes = lax.broadcasted_iota(jnp.int32, p.shape, 0)   # (C, T)
    mask = classes == lab                                   # (C, T) bool
    # padded tail has label = -1, which never matches -> contributes nothing

    acc_inter[...] += jnp.sum(jnp.where(mask, p, 0.0), axis=1, keepdims=True)
    acc_sqp[...] += jnp.sum(p * p, axis=1, keepdims=True)
    acc_sqo[...] += jnp.sum(mask.astype(jnp.float32), axis=1, keepdims=True)

    @pl.when((n == pl.num_programs(0) - 1) & (h == pl.num_programs(1) - 1))
    def _finalize():
        inter = acc_inter[...]
        union = acc_sqp[...] + acc_sqo[...]
        dice = jnp.sum((2.0 * inter + SMOOTH) / (union + SMOOTH))
        out_ref[...] = jnp.reshape(1.0 - dice / C, (1, 1))


def dice_loss(pred, label, *, hw_tile_target=4096,
              max_block_bytes=2 * 1024 * 1024):
    """pred: (N, C, H, W) float (any float dtype), label: (N, 1, H, W) int."""
    N, C, H, W = pred.shape
    HW = H * W

    pred_f = pred.reshape(N, C, HW)            # keep native dtype (bf16/f32)

    # --- choose an HW tile: multiple of 128, bounded by a VMEM byte budget ---
    elem_bytes = jnp.dtype(pred_f.dtype).itemsize
    tile_cap = max(128, (max_block_bytes // max(1, C * elem_bytes)) // 128 * 128)
    hw_full = ((HW + 127) // 128) * 128        # smallest lane-aligned cover of HW
    hw_tile = int(min(hw_tile_target, tile_cap, hw_full))
    hw_tiles = (HW + hw_tile - 1) // hw_tile
    hw_padded = hw_tiles * hw_tile

    # --- shrink label traffic + pad the spatial remainder ---
    label_dtype = jnp.int8 if C <= 127 else jnp.int32
    label_f = label.reshape(N, 1, HW).astype(label_dtype)
    if hw_padded != HW:
        pad = hw_padded - HW
        pred_f = jnp.pad(pred_f, ((0, 0), (0, 0), (0, pad)))
        label_f = jnp.pad(label_f, ((0, 0), (0, 0), (0, pad)),
                          constant_values=-1)  # sentinel: never matches a class

    out = pl.pallas_call(
        _dice_loss_kernel,
        out_shape=jax.ShapeDtypeStruct((1, 1), jnp.float32),
        grid_spec=pltpu.PrefetchScalarGridSpec(
            num_scalar_prefetch=0,
            grid=(N, hw_tiles),
            in_specs=[
                pl.BlockSpec((1, C, hw_tile), lambda n, h: (n, 0, h)),
                pl.BlockSpec((1, 1, hw_tile), lambda n, h: (n, 0, h)),
            ],
            out_specs=pl.BlockSpec((1, 1), lambda n, h: (0, 0)),
            scratch_shapes=[
                pltpu.VMEM((C, 1), jnp.float32),
                pltpu.VMEM((C, 1), jnp.float32),
                pltpu.VMEM((C, 1), jnp.float32),
            ],
        ),
        compiler_params=pltpu.CompilerParams(
            # accumulators are shared state across every grid step -> arbitrary
            dimension_semantics=("arbitrary", "arbitrary"),
            vmem_limit_bytes=32 * 1024 * 1024,
        ),
    )(pred_f, label_f)
    # TODO(synk): on v7x, the HW axis could be split across the 2 TensorCores
    # with per-core partial sums combined in the wrapper for ~2x streaming BW.
    return out[0, 0]


def dice_loss_ref(pred, label):
    """Pure-JAX reference mirroring the PyTorch forward."""
    N, C, H, W = pred.shape
    onehot = jax.nn.one_hot(label[:, 0], C, axis=1, dtype=jnp.float32)
    p = pred.astype(jnp.float32)
    dice = 0.0
    for c in range(C):
        inter = jnp.sum(p[:, c] * onehot[:, c])
        union = jnp.sum(p[:, c] ** 2) + jnp.sum(onehot[:, c] ** 2)
        dice = dice + (2.0 * inter + SMOOTH) / (union + SMOOTH)
    return 1.0 - dice / C


if __name__ == "__main__":
    key = jax.random.PRNGKey(0)
    k1, k2, k3, k4 = jax.random.split(key, 4)

    # case 1: lane-aligned spatial size (no padding path)
    N, C, H, W = 2, 4, 16, 16
    pred = jax.random.normal(k1, (N, C, H, W), dtype=jnp.float32)
    label = jax.random.randint(k2, (N, 1, H, W), 0, C, dtype=jnp.int32)
    loss = dice_loss(pred, label)
    jax.block_until_ready(loss)
    ref = dice_loss_ref(pred, label)
    assert jnp.allclose(loss, ref, rtol=1e-4, atol=1e-5), (loss, ref)

    # case 2: non-128-multiple spatial size (exercises the padded tail)
    N2, C2, H2, W2 = 2, 4, 20, 20
    pred2 = jax.random.normal(k3, (N2, C2, H2, W2), dtype=jnp.float32)
    label2 = jax.random.randint(k4, (N2, 1, H2, W2), 0, C2, dtype=jnp.int32)
    loss2 = dice_loss(pred2, label2)
    jax.block_until_ready(loss2)
    ref2 = dice_loss_ref(pred2, label2)
    assert jnp.allclose(loss2, ref2, rtol=1e-4, atol=1e-5), (loss2, ref2)

    print("KERNEL_OK")
</pallas_src>

<mosaic_0001>
module attributes {stable_mosaic.version = 11 : i64} {
  func.func @_dice_loss_kernel(%arg0: i32, %arg1: i32, %arg2: memref<1x4x256xf32, #tpu.memory_space<vmem>>, %arg3: memref<1x1x256xi8, #tpu.memory_space<vmem>>, %arg4: memref<1x1xf32, #tpu.memory_space<vmem>>, %arg5: memref<4x1xf32, #tpu.memory_space<vmem>>, %arg6: memref<4x1xf32, #tpu.memory_space<vmem>>, %arg7: memref<4x1xf32, #tpu.memory_space<vmem>>) attributes {dimension_semantics = [#tpu.dimension_semantics<arbitrary>, #tpu.dimension_semantics<arbitrary>], iteration_bounds = array<i64: 2, 1>, scalar_prefetch = 0 : i64, scratch_operands = 3 : i64, tpu.core_type = #tpu.core_type<tc>, window_params = [{transform_indices = @transform_0, window_bounds = array<i64: 1, 4, 256>}, {transform_indices = @transform_1, window_bounds = array<i64: 1, 1, 256>}, {pipeline_mode = #tpu.pipeline_mode<synchronous>, transform_indices = @transform_2, window_bounds = array<i64: 1, 1>}]} {
    %c0_i32 = arith.constant 0 : i32
    %0 = arith.cmpi eq, %arg0, %c0_i32 : i32
    %c0_i32_0 = arith.constant 0 : i32
    %1 = arith.cmpi eq, %arg1, %c0_i32_0 : i32
    %2 = arith.andi %0, %1 : i1
    %3 = arith.extui %2 : i1 to i32
    %c0_i32_1 = arith.constant 0 : i32
    %4 = arith.cmpi ne, %3, %c0_i32_1 : i32
    scf.if %4 {
      %cst_24 = arith.constant 0.000000e+00 : f32
      %38 = vector.broadcast %cst_24 : f32 to vector<4x1xf32>
      %c0_25 = arith.constant 0 : index
      %c0_26 = arith.constant 0 : index
      %39 = vector.load %arg5[%c0_25, %c0_26] : memref<4x1xf32, #tpu.memory_space<vmem>>, vector<4x1xf32>
      tpu.vector_store %arg5[%c0_25, %c0_26], %38 {strides = array<i32>} : memref<4x1xf32, #tpu.memory_space<vmem>>, vector<4x1xf32>,
      %cst_27 = arith.constant 0.000000e+00 : f32
      %40 = vector.broadcast %cst_27 : f32 to vector<4x1xf32>
      %c0_28 = arith.constant 0 : index
      %c0_29 = arith.constant 0 : index
      %41 = vector.load %arg6[%c0_28, %c0_29] : memref<4x1xf32, #tpu.memory_space<vmem>>, vector<4x1xf32>
      tpu.vector_store %arg6[%c0_28, %c0_29], %40 {strides = array<i32>} : memref<4x1xf32, #tpu.memory_space<vmem>>, vector<4x1xf32>,
      %cst_30 = arith.constant 0.000000e+00 : f32
      %42 = vector.broadcast %cst_30 : f32 to vector<4x1xf32>
      %c0_31 = arith.constant 0 : index
      %c0_32 = arith.constant 0 : index
      %43 = vector.load %arg7[%c0_31, %c0_32] : memref<4x1xf32, #tpu.memory_space<vmem>>, vector<4x1xf32>
      tpu.vector_store %arg7[%c0_31, %c0_32], %42 {strides = array<i32>} : memref<4x1xf32, #tpu.memory_space<vmem>>, vector<4x1xf32>,
    } else {
    }
    %c0 = arith.constant 0 : index
    %c0_2 = arith.constant 0 : index
    %c0_3 = arith.constant 0 : index
    %5 = vector.load %arg2[%c0, %c0_2, %c0_3] : memref<1x4x256xf32, #tpu.memory_space<vmem>>, vector<1x4x256xf32>
    %6 = vector.shape_cast %5 : vector<1x4x256xf32> to vector<4x256xf32>
    %c0_4 = arith.constant 0 : index
    %c0_5 = arith.constant 0 : index
    %c0_6 = arith.constant 0 : index
    %7 = vector.load %arg3[%c0_4, %c0_5, %c0_6] : memref<1x1x256xi8, #tpu.memory_space<vmem>>, vector<1x1x256xi8>
    %8 = vector.shape_cast %7 : vector<1x1x256xi8> to vector<1x256xi8>
    %9 = arith.extsi %8 : vector<1x256xi8> to vector<1x256xi32>
    %10 = tpu.iota {dimensions = array<i32: 0>} : vector<4x256xi32>
    %11 = vector.broadcast %9 : vector<1x256xi32> to vector<4x256xi32>
    %12 = arith.cmpi eq, %10, %11 : vector<4x256xi32>
    %c0_7 = arith.constant 0 : index
    %c0_8 = arith.constant 0 : index
    %13 = vector.load %arg5[%c0_7, %c0_8] : memref<4x1xf32, #tpu.memory_space<vmem>>, vector<4x1xf32>
    %cst = arith.constant 0.000000e+00 : f32
    %14 = vector.broadcast %cst : f32 to vector<4x256xf32>
    %15 = arith.select %12, %6, %14 : vector<4x256xi1>, vector<4x256xf32>
    %cst_9 = arith.constant dense<0.000000e+00> : vector<4xf32>
    %16 = vector.multi_reduction <add>, %15, %cst_9 [1] : vector<4x256xf32> to vector<4xf32>
    %17 = vector.shape_cast %16 : vector<4xf32> to vector<4x1xf32>
    %18 = arith.addf %13, %17 : vector<4x1xf32>
    %c0_10 = arith.constant 0 : index
    %c0_11 = arith.constant 0 : index
    %19 = vector.load %arg5[%c0_10, %c0_11] : memref<4x1xf32, #tpu.memory_space<vmem>>, vector<4x1xf32>
    tpu.vector_store %arg5[%c0_10, %c0_11], %18 {strides = array<i32>} : memref<4x1xf32, #tpu.memory_space<vmem>>, vector<4x1xf32>,
    %c0_12 = arith.constant 0 : index
    %c0_13 = arith.constant 0 : index
    %20 = vector.load %arg6[%c0_12, %c0_13] : memref<4x1xf32, #tpu.memory_space<vmem>>, vector<4x1xf32>
    %21 = arith.mulf %6, %6 : vector<4x256xf32>
    %cst_14 = arith.constant dense<0.000000e+00> : vector<4xf32>
    %22 = vector.multi_reduction <add>, %21, %cst_14 [1] : vector<4x256xf32> to vector<4xf32>
    %23 = vector.shape_cast %22 : vector<4xf32> to vector<4x1xf32>
    %24 = arith.addf %20, %23 : vector<4x1xf32>
    %c0_15 = arith.constant 0 : index
    %c0_16 = arith.constant 0 : index
    %25 = vector.load %arg6[%c0_15, %c0_16] : memref<4x1xf32, #tpu.memory_space<vmem>>, vector<4x1xf32>
    tpu.vector_store %arg6[%c0_15, %c0_16], %24 {strides = array<i32>} : memref<4x1xf32, #tpu.memory_space<vmem>>, vector<4x1xf32>,
    %c0_17 = arith.constant 0 : index
    %c0_18 = arith.constant 0 : index
    %26 = vector.load %arg7[%c0_17, %c0_18] : memref<4x1xf32, #tpu.memory_space<vmem>>, vector<4x1xf32>
    %27 = arith.extui %12 : vector<4x256xi1> to vector<4x256xi32>
    %28 = arith.sitofp %27 : vector<4x256xi32> to vector<4x256xf32>
    %cst_19 = arith.constant dense<0.000000e+00> : vector<4xf32>
    %29 = vector.multi_reduction <add>, %28, %cst_19 [1] : vector<4x256xf32> to vector<4xf32>
    %30 = vector.shape_cast %29 : vector<4xf32> to vector<4x1xf32>
    %31 = arith.addf %26, %30 : vector<4x1xf32>
    %c0_20 = arith.constant 0 : index
    %c0_21 = arith.constant 0 : index
    %32 = vector.load %arg7[%c0_20, %c0_21] : memref<4x1xf32, #tpu.memory_space<vmem>>, vector<4x1xf32>
    tpu.vector_store %arg7[%c0_20, %c0_21], %31 {strides = array<i32>} : memref<4x1xf32, #tpu.memory_space<vmem>>, vector<4x1xf32>,
    %c1_i32 = arith.constant 1 : i32
    %33 = arith.cmpi eq, %arg0, %c1_i32 : i32
    %c0_i32_22 = arith.constant 0 : i32
    %34 = arith.cmpi eq, %arg1, %c0_i32_22 : i32
    %35 = arith.andi %33, %34 : i1
    %36 = arith.extui %35 : i1 to i32
    %c0_i32_23 = arith.constant 0 : i32
    %37 = arith.cmpi ne, %36, %c0_i32_23 : i32
    scf.if %37 {
      %c0_24 = arith.constant 0 : index
      %c0_25 = arith.constant 0 : index
      %38 = vector.load %arg5[%c0_24, %c0_25] : memref<4x1xf32, #tpu.memory_space<vmem>>, vector<4x1xf32>
      %c0_26 = arith.constant 0 : index
      %c0_27 = arith.constant 0 : index
      %39 = vector.load %arg6[%c0_26, %c0_27] : memref<4x1xf32, #tpu.memory_space<vmem>>, vector<4x1xf32>
      %c0_28 = arith.constant 0 : index
      %c0_29 = arith.constant 0 : index
      %40 = vector.load %arg7[%c0_28, %c0_29] : memref<4x1xf32, #tpu.memory_space<vmem>>, vector<4x1xf32>
      %41 = arith.addf %39, %40 : vector<4x1xf32>
      %cst_30 = arith.constant 2.000000e+00 : f32
      %42 = vector.broadcast %cst_30 : f32 to vector<4x1xf32>
      %43 = arith.mulf %42, %38 : vector<4x1xf32>
      %cst_31 = arith.constant 9.99999974E-6 : f32
      %44 = vector.broadcast %cst_31 : f32 to vector<4x1xf32>
      %45 = arith.addf %43, %44 : vector<4x1xf32>
      %cst_32 = arith.constant 9.99999974E-6 : f32
      %46 = vector.broadcast %cst_32 : f32 to vector<4x1xf32>
      %47 = arith.addf %41, %46 : vector<4x1xf32>
      %48 = arith.divf %45, %47 : vector<4x1xf32>
      %49 = vector.shape_cast %48 : vector<4x1xf32> to vector<1x4x1xf32>
      %cst_33 = arith.constant dense<0.000000e+00> : vector<1xf32>
      %50 = vector.multi_reduction <add>, %49, %cst_33 [1, 2] : vector<1x4x1xf32> to vector<1xf32>
      %51 = vector.shape_cast %50 : vector<1xf32> to vector<1x1x1xf32>
      %52 = vector.extract %51[0, 0, 0] : f32 from vector<1x1x1xf32>
      %cst_34 = arith.constant 4.000000e+00 : f32
      %53 = arith.divf %52, %cst_34 : f32
      %cst_35 = arith.constant 1.000000e+00 : f32
      %54 = arith.subf %cst_35, %53 : f32
      %55 = vector.broadcast %54 : f32 to vector<1x1xf32>
      %c0_36 = arith.constant 0 : index
      %c0_37 = arith.constant 0 : index
      %56 = vector.load %arg4[%c0_36, %c0_37] : memref<1x1xf32, #tpu.memory_space<vmem>>, vector<1x1xf32>
      tpu.vector_store %arg4[%c0_36, %c0_37], %55 {strides = array<i32>} : memref<1x1xf32, #tpu.memory_space<vmem>>, vector<1x1xf32>,
    } else {
    }
    return
  }
  func.func @transform_0(%arg0: i32, %arg1: i32) -> (i32, i32, i32) {
    %c0_i32 = arith.constant 0 : i32
    %c0_i32_0 = arith.constant 0 : i32
    return %arg0, %c0_i32, %arg1 : i32, i32, i32
  }
  func.func @transform_1(%arg0: i32, %arg1: i32) -> (i32, i32, i32) {
    %c0_i32 = arith.constant 0 : i32
    %c0_i32_0 = arith.constant 0 : i32
    return %arg0, %c0_i32, %arg1 : i32, i32, i32
  }
  func.func @transform_2(%arg0: i32, %arg1: i32) -> (i32, i32) {
    %c0_i32 = arith.constant 0 : i32
    %c0_i32_0 = arith.constant 0 : i32
    %c0_i32_1 = arith.constant 0 : i32
    return %c0_i32, %c0_i32_0 : i32, i32
  }
}

</mosaic_0001>

<bundles_post_ra>
// kernel: tpu_custom_call.1
= control target key start
LH: loop header
LB: loop body
LE: loop exit
PB: predicated region body
PF: predicated region fallthrough
CT: control target
= control target key end

     0   :  { %7 = vsyncpa [#allocation6], 0  ;;  %s768_s0 = inlined_call_operand.hbm [shape: f32[2,4,256], index: 0, kind: input, shape index: {}]   ;;  %s769_s1 = inlined_call_operand.vmem [shape: s8[2,1,256], index: 1, kind: input, shape index: {}]   ;;  %s770_s2 = inlined_call_operand.hbm [shape: f32[1,1], index: 2, kind: output, shape index: {}]  }
   0x1   :  { %9 = vsyncpa [#allocation6 + $0x1], 0 }
   0x2   :  { %10 = vsyncpa [#allocation7], 0  ;;  %s605_s9 = smov 0   ;;  %s607_s10 = smov 0  }
   0x3   :  { %s609_s11 = smov 0   ;;  %s611_s12 = smov 0  }
   0x4   :  { %s613_s13 = smov 0   ;;  %s615_s14 = smov 0  }
   0x5 LB: > { %s385_s15 = sadd.s32 4294967295, %s584_s14   ;;  %s28_s16 = sadd.s32 1, %s580_s13  ;;  %s584_s14 = sphi %s615_s14, %s16_s14   ;;  %s580_s13 = sphi %s613_s13, %s781_s13   ;;  %s576_s12 = sphi %s611_s12, %s780_s12   ;;  %s572_s11 = sphi %s609_s11, %s779_s11   ;;  %s568_s10 = sphi %s607_s10, %s778_s10   ;;  %s564_s9 = sphi %s605_s9, %s777_s9  }
   0x6   : > { %p30_p0 = scmp.ge.s32.totalorder %s28_s16, 2  ;;  %s37_s17 = sadd.s32 1, %s572_s11 }
   0x7   : > { %p44_p1 = scmp.ne.s32.totalorder %s572_s11, %s568_s10  ;;  %p45_p2 = scmp.eq.s32.totalorder %s584_s14, 0 }
   0x8   : > { %s783_s16 = smov (%p30_p0, %s28_s16), 0  ;;  %p50_p4 = scmp.ne.s32.totalorder %s568_s10, %s564_s9 }
   0x9   : > { %p641_p3 = por %p45_p2, %p44_p1  ;;  %s32_s19 = ssub.s32 %s580_s13, %s783_s16 }
   0xa   : > { %p51_p5 = scmp.eq.s32.totalorder %s385_s15, 0  ;;  %p35_p6 = scmp.eq.s32.totalorder %s32_s19, 0 }
   0xb   : > { %p417_p8 = scmp.lt.s32.totalorder %s584_s14, 2  ;;  %s123_s22 = sand.u32 1, %s572_s11  }
   0xc   : > { %p650_p7 = por %p51_p5, %p50_p4  ;;  %s402_s23 = sshll.u32 %s580_s13, 7 }
   0xd   : > { %s656_s21 = scalar_select %p35_p6, %s572_s11, %s37_s17  }
   0xe   : > { %s388_s24 = sshll.u32 %s123_s22, 3  ;;  %s663_s27 = scalar_lea.hbm %s768_s0, %s402_s23 }
   0xf   : > { %s127_s28 = scalar_lea.vmem [#allocation5], %s388_s24  ;;  %p667_p9 = pnand %p417_p8, %p641_p3 }
  0x10   : > { %s137_s29 = sshll.u32 %s127_s28, 4  ;;  %s124_s3 = scalar_lea.sflag [#allocation6], %s123_s22  ;;  %s671_s29 = int_to_ptr.vmem [resolvable:$true] %s137_s29 }
  0x11   : > { %s474_s4 = scalar_lea.hbm %s663_s27, 128  ;;  %p476_p13 = pneg %p667_p9 }
  0x12   : > { %p475_p12 = scmp.ne.s32.totalorder %s663_s27, %s474_s4  ;;  %s479_s7 = scalar_lea.hbm %s768_s0, 256 }
  0x13   : > { %p480_p2 = scmp.lt.u32.totalorder %s663_s27, %s768_s0  ;;  %p481_p3 = scmp.lt.u32.totalorder %s479_s7, %s474_s4 }
  0x14   : > { %p477_p0 = pnand %p476_p13, %p475_p12  ;;  %p483_p5 = scmp.lt.u32.totalorder %s474_s4, %s663_s27 }
  0x15   : > { %p482_p4 = por %p481_p3, %p480_p2 }
  0x16   : > { %p478_p1 = pneg %p477_p0 }
  0x17   : > { %p484_p6 = por %p483_p5, %p482_p4 }
  0x19   : > { %p485_p8 = pnand %p484_p6, %p478_p1 }
  0x1b   : > { %488 = shalt.err (!%p485_p8)
}
  0x1c   : > { %s489_s17 = scalar_lea.vmem %s671_s29, 128  ;;  %s586_s18 = smov [#allocation5]  }
  0x1d   : > { %p490_p12 = scmp.ne.s32.totalorder %s671_s29, %s489_s17  ;;  %s494_s19 = sshll.u32 %s586_s18, 4  ;;  %s495_s19 = int_to_ptr.vmem [resolvable:$false] %s494_s19 }
  0x1e   : > { %s496_s22 = scalar_lea.vmem %s495_s19, 256  ;;  %p497_p11 = scmp.lt.s32.totalorder %s671_s29, %s495_s19 }
  0x1f   : > { %p492_p0 = pnand %p490_p12, %p476_p13  ;;  %p498_p2 = scmp.lt.s32.totalorder %s496_s22, %s489_s17 }
  0x21   : > { %p493_p10 = pneg %p492_p0  ;;  %p499_p3 = por %p498_p2, %p497_p11 }
  0x23   : > { %p500_p4 = pnand %p499_p3, %p493_p10 }
  0x25   : > { %503 = shalt.err (!%p500_p4)
}
  0x26   : > { %416 = dma.hbm_to_vmem [thread:$0]  (!%p667_p9), %s663_s27, 128, %s671_s29, %s124_s3  }
  0x27   : > { %p774_p1 = scmp.lt.s32.totalorder %s584_s14, 3  ;;  %p775_p5 = scmp.ge.s32.totalorder %s584_s14, 1 }
  0x29   : > { %p155_p13 = pnand %p775_p5, %p774_p1 }
  0x2a   : > { %s160_s23 = sand.u32 (!%p155_p13), 1, %s568_s10  }
  0x2b   : > { %158 = sbr.rel (%p155_p13) target bundleno = 485 (0x1e5), region = 28  ;;  %s392_s24 = sshll.u32 (!%p155_p13), %s160_s23, 3 }
  0x2c   : > { %s161_s25 = scalar_lea.sflag (!%p155_p13), [#allocation6], %s160_s23  ;;  %s164_s26 = scalar_lea.vmem (!%p155_p13), [#allocation5], %s392_s24 }
  0x32   : > { %555 = dma.done.wait (%p650_p7), %s161_s25, 128  }
  0x33   : > { %557 = vsyncadd (%p650_p7), %s161_s25, 4294967168  ;;  %p190_p10 = scmp.lt.s32.totalorder %s576_s12, 1  ;;  %p198_p9 = scmp.eq.s32.totalorder %s576_s12, 0 }
  0x34   : > { %vm204_vm0 = vcmask (%p198_p9), 3072   ;;  %v587_v0 = vmov (%p198_p9), 0.0  }
  0x35   : > { %s191_s27 = scalar_select %p190_p10, %s576_s12, 1 }
  0x36   : > { %203 = sbr.rel (!%p198_p9) target bundleno = 61 (0x3d), region = 36  ;;  %205 = vst.msk [vmem:[#allocation2] sm:$0xf] (%p198_p9), %vm204_vm0, %v587_v0  ;;  %206 = vst.msk [vmem:[#allocation3] sm:$0xf] (%p198_p9), %vm204_vm0, %v587_v0 }
  0x37   : > { %s393_s28 = sshll.u32 %s191_s27, 1  ;;  %207 = vst.msk [vmem:[#allocation4] sm:$0xf] (%p198_p9), %vm204_vm0, %v587_v0 }
  0x38   : > { %s196_s3 = scalar_lea.vmem %s769_s1, %s393_s28 }
  0x3d PF: > { %v209_v1 = vld [vmem:[%s196_s3] sm:$0x3]  ;;  %v211_v2 = vlaneseq  ;;  %v208_v3 = vld [vmem:[%s164_s26] sm:$0xff]  ;;  %vm237_vm1 = vcmask 1043456   ;;  %v588_v19 = vmov 0.0   ;;  %p270_p7 = scmp.eq.s32.totalorder %s576_s12, 1 }
  0x3e   : > { %v210_v4 = vunpack.c.0.s8 %v209_v1  ;;  %v247_v6 = vmul.f32 %v208_v3, %v208_v3  ;;  %v233_v12 = vcombine.high %v208_v3, %v208_v3  ;;  %v231_v29 = vld [vmem:[#allocation2] sm:$0xf]  ;;  %v258_v30 = vld [vmem:[#allocation4] sm:$0xf]  ;;  %vm244_vm4 = vcmask 3072  }
  0x3f   : > { %v212_v5 = vshrl.u32 %v211_v2, 7  ;;  %v246_v35 = vld [vmem:[#allocation3] sm:$0xf]  ;;  %vm299_vm5 = vcmask (%p270_p7), 0  }
  0x40   : > { %v249_v11 = vcombine.high %v247_v6, %v247_v6  ;;  %v251_v15 = vsel %vm237_vm1, %v247_v6, 0.0 }
  0x41   : > { %v215_v7 = vsub.s32 0, %v212_v5  ;;  %v219_v8 = vsub.s32 4, %v212_v5 }
  0x42   : > { %v252_v16 = vsel %vm237_vm1, %v249_v11, 0.0 }
  0x43   : > { %v216_v9 = vrot.slane %v210_v4, %v215_v7  ;;  %v220_v10 = vrot.slane %v210_v4, %v219_v8  ;;  %v253_v28 = vadd.f32 %v252_v16, %v251_v15 }
  0x45   : > { %v224_v13 = vrot.slane %v216_v9, %v215_v7  ;;  %v228_v14 = vrot.slane %v220_v10, %v215_v7 }
  0x47   : > { %vm229_vm2 = vcmp.eq.s32.totalorder %v212_v5, %v224_v13  ;;  %vm230_vm3 = vcmp.eq.s32.totalorder %v212_v5, %v228_v14 }
  0x48   : > { %v235_v17 = vsel %vm229_vm2, %v208_v3, 0.0  ;;  %v236_v18 = vsel %vm230_vm3, %v233_v12, 0.0  ;;  %v395_v20 = vsel %vm229_vm2, 1.0, %v588_v19  ;;  %v396_v21 = vsel %vm230_vm3, 1.0, %v588_v19 }
  0x49   : > { %v238_v22 = vsel %vm237_vm1, %v235_v17, 0.0  ;;  %v239_v23 = vsel %vm237_vm1, %v236_v18, 0.0  ;;  %v263_v24 = vsel %vm237_vm1, %v395_v20, 0.0  ;;  %v264_v25 = vsel %vm237_vm1, %v396_v21, 0.0 }
  0x4a   : > { %v240_v26 = vadd.f32 %v239_v23, %v238_v22  ;;  %v265_v27 = vadd.f32 %v264_v25, %v263_v24 }
  0x4c   : > { %241 = vadd.xlane.f32.xlu0 %v240_v26  ;;  %266 = vadd.xlane.f32.xlu1 %v265_v27 }
  0x50   : > { %254 = vadd.xlane.f32.xlu0 %v253_v28 }
  0xd9   : > { %v242_v31 = vpop.xlane.xlu0 %241  ;;  %v267_v32 = vpop.xlane.xlu1 %266 }
  0xda   : > { %v243_v33 = vadd.f32 %v242_v31, %v231_v29  ;;  %v268_v34 = vadd.f32 %v267_v32, %v258_v30  ;;  %274 = sbr.rel (!%p270_p7) target bundleno = 460 (0x1cc), region = 40 }
  0xdc   : > { %245 = vst.msk [vmem:[#allocation2] sm:$0xf] %vm244_vm4, %v243_v33  ;;  %269 = vst.msk [vmem:[#allocation4] sm:$0xf] %vm244_vm4, %v268_v34 }
  0xdd   : > { %v255_v36 = vpop.xlane.xlu0 %254 }
  0xde   : > { %v256_v37 = vadd.f32 %v255_v36, %v246_v35 }
  0xe0   : > { %257 = vst.msk [vmem:[#allocation3] sm:$0xf] %vm244_vm4, %v256_v37 }
  0xe3   : > { %v277_v39 = vld [vmem:[#allocation4] sm:$0xf]  ;;  %v275_v42 = vld [vmem:[#allocation2] sm:$0xf] }
  0xe4   : > { %v279_v43 = vmul.f32 2.0, %v275_v42 }
  0xe6   : > { %v280_v44 = vadd.f32 1e-05, %v279_v43 }
  0xe7   : > { %v276_v38 = vld [vmem:[#allocation3] sm:$0xf] }
  0xe8   : > { %v278_v40 = vadd.f32 %v277_v39, %v276_v38 }
  0xea   : > { %v281_v41 = vadd.f32 1e-05, %v278_v40 }
  0xec   : > { %472 = vrcp.f32 %v281_v41 }
  0xf6   : > { %v473_v45 = vpop.eup %472 }
  0xf7   : > { %v283_v46 = vmul.f32 %v473_v45, %v280_v44 }
  0xf9   : > { %v284_v47 = vsel %vm244_vm4, %v283_v46, 0.0 }
  0xfa   : > { %285 = vadd.xlane.f32.xlu0 %v284_v47 }
 0x187   : > { %v286_v48 = vpop.xlane.xlu0 %285 }
 0x188   : > { %v287_v49 = vrot.slane %v286_v48, 4 }
 0x18a   : > { %v288_v50 = vadd.f32 %v287_v49, %v286_v48 }
 0x18c   : > { %v289_v51 = vrot.slane %v288_v50, 2 }
 0x18e   : > { %v290_v52 = vadd.f32 %v289_v51, %v288_v50 }
 0x190   : > { %v291_v53 = vrot.slane %v290_v52, 1 }
 0x192   : > { %v292_v54 = vadd.f32 %v291_v53, %v290_v52 }
 0x194   : > { %405 = vpush %v292_v54 }
 0x1c5   : > { %s406_s12 = spop %405 }
 0x1c6   : > { %s296_s20 = smul.f32 0.25, %s406_s12 }
 0x1c8   : > { %s297_s4 = ssub.f32 1.0, %s296_s20 }
 0x1ca   : > { %v298_v55 = vstv %s297_s4 }
 0x1cb   : > { %300 = vst.msk [vmem:[#allocation8] sm:$0x1] %vm299_vm5, %v298_v55 }
 0x1cc PF: > { %p724_p11 = scmp.eq.s32.totalorder %s385_s15, 1  ;;  %s589_s6 = smov [#allocation8]  }
 0x1cd   : > { %s308_s7 = sshll.u32 %s589_s6, 4  ;;  %s309_s7 = int_to_ptr.vmem [resolvable:$true] %s308_s7 }
 0x1ce   : > { %s504_s8 = scalar_lea.vmem %s309_s7, 16  ;;  %s510_s9 = scalar_lea.vmem %s309_s7, 32 }
 0x1cf   : > { %p505_p6 = scmp.ne.s32.totalorder %s309_s7, %s504_s8  ;;  %p511_p0 = scmp.lt.s32.totalorder %s309_s7, %s309_s7 }
 0x1d0   : > { %p512_p2 = scmp.lt.s32.totalorder %s510_s9, %s504_s8 }
 0x1d1   : > { %p506_p8 = pnand %p505_p6, %p724_p11 }
 0x1d2   : > { %p513_p3 = por %p512_p2, %p511_p0 }
 0x1d3   : > { %p507_p12 = pneg %p506_p8 }
 0x1d5   : > { %p514_p4 = pnand %p513_p3, %p507_p12 }
 0x1d7   : > { %517 = shalt.err (!%p514_p4)
}
 0x1d8   : > { %s518_s18 = scalar_lea.hbm %s770_s2, 16 }
 0x1d9   : > { %p519_p1 = scmp.ne.s32.totalorder %s770_s2, %s518_s18  ;;  %p524_p10 = scmp.lt.u32.totalorder %s518_s18, %s770_s2 }
 0x1db   : > { %p520_p5 = pnand %p519_p1, %p724_p11 }
 0x1dd   : > { %p521_p13 = pneg %p520_p5 }
 0x1df   : > { %p526_p9 = pnand %p524_p10, %p521_p13 }
 0x1e1   : > { %529 = shalt.err (!%p526_p9)
}
 0x1e2   : > { %410 = dma.vmem_to_hbm [thread:$0]  (%p724_p11), %s309_s7, 16, %s770_s2, [#allocation7]  }
 0x1e3   : > { %559 = dma.done.wait (%p724_p11), [#allocation7], 16  }
 0x1e4   : > { %561 = vsyncadd (%p724_p11), [#allocation7], 4294967280 }
 0x1e5 PF: > { %s16_s14 = sadd.s32 1, %s584_s14   ;;  %s777_s9 = smov %s568_s10 }
 0x1e6   : > { %p13_p7 = scmp.ge.s32.totalorder %s16_s14, 4   ;;  %s778_s10 = smov %s572_s11 }
 0x1e7   : > { %s779_s11 = smov %s656_s21  ;;  %s780_s12 = smov %s580_s13 }
 0x1e8   : > { %s781_s13 = smov %s783_s16  ;;  %15 = sbr.rel (!%p13_p7) target bundleno = 5 (0x5), region = 76 }
 0x1ef   :  { %321 = vsyncpa [#allocation6], 1 }
 0x1f0   :  { %323 = vsyncpa [#allocation6 + $0x1], 1 }
 0x1f1   :  { %324 = vsyncpa [#allocation7], 1 }
 0x1f2   :  { %326 = vsyncpa [#allocation7 + $0x1], 1 }

</bundles_post_ra>
